<compile_context>
chip_gen: v7x
topology: tpu7x:2x2x1
jax: 0.10.0
libtpu: 0.0.40
codegen_flags: <defaults>
</compile_context>

<pallas_src>
import jax
import jax.numpy as jnp
from jax.experimental import pallas as pl
from jax.experimental.pallas import tpu as pltpu


def rnn_seq_kernel(x_ref, h0_ref, wx_ref, wh_ref, b_ref, out_ref, hid_ref):
    t = pl.program_id(0)

    # The hidden-output block is resident across the (sequential) time axis,
    # so it doubles as the recurrent carry.  Seed it from h0 on step 0.
    @pl.when(t == 0)
    def _():
        hid_ref[...] = h0_ref[...]

    x = x_ref[0]              # (B, I)  f32
    h = hid_ref[...]          # (B, H)  f32
    H = hid_ref.shape[1]

    # Fused i2h / i2o:  cat(x, h) @ [W_i2h | W_i2o].T  ==  x @ Wx + h @ Wh + b
    y = (jnp.dot(x, wx_ref[...], preferred_element_type=jnp.float32)
         + jnp.dot(h, wh_ref[...], preferred_element_type=jnp.float32)
         + b_ref[...])        # (B, H + O)

    hid_ref[...] = y[:, :H]   # new hidden, carried to the next grid step
    logits = y[:, H:]         # (B, O)

    # LogSoftmax along the feature axis (dim=1 in the PyTorch module).
    m = jnp.max(logits, axis=1, keepdims=True)
    shifted = logits - m
    lse = jnp.log(jnp.sum(jnp.exp(shifted), axis=1, keepdims=True))
    out_ref[0] = shifted - lse


def prepare_params(params, input_size):
    """One-time packing of PyTorch-layout Linear params for the kernel."""
    I = input_size
    w_i2h, b_i2h = params["w_i2h"], params["b_i2h"]   # (H, I+H), (H,)
    w_i2o, b_i2o = params["w_i2o"], params["b_i2o"]   # (O, I+H), (O,)
    H = w_i2h.shape[0]
    O = w_i2o.shape[0]
    # cat(x, h) @ W.T == x @ W[:, :I].T + h @ W[:, I:].T, fused over [i2h | i2o].
    wx = jnp.concatenate([w_i2h[:, :I], w_i2o[:, :I]], axis=0).T   # (I, H+O)
    wh = jnp.concatenate([w_i2h[:, I:], w_i2o[:, I:]], axis=0).T   # (H, H+O)
    b = jnp.concatenate([b_i2h, b_i2o]).reshape(1, H + O)          # (1, H+O)
    return {"wx": wx, "wh": wh, "b": b, "hidden_size": H, "output_size": O}


def rnn_sequence_forward(xs, h0, packed):
    """xs: (T, B, I), h0: (B, H) -> (log_probs (T, B, O), final hidden (B, H))."""
    T, B, I = xs.shape
    H = packed["hidden_size"]
    O = packed["output_size"]
    HO = H + O

    cost = pl.CostEstimate(
        flops=2 * T * B * (I + H) * HO + 6 * T * B * HO,
        transcendentals=T * B * (O + 1),
        bytes_accessed=4 * (I * HO + H * HO + HO + T * B * (I + O) + 2 * B * H),
    )

    out, hid = pl.pallas_call(
        rnn_seq_kernel,
        grid=(T,),
        in_specs=[
            pl.BlockSpec((1, B, I), lambda t: (t, 0, 0)),   # x[t], auto-pipelined
            pl.BlockSpec((B, H), lambda t: (0, 0)),          # h0 (VMEM-resident)
            pl.BlockSpec((I, HO), lambda t: (0, 0)),         # Wx (VMEM-resident)
            pl.BlockSpec((H, HO), lambda t: (0, 0)),         # Wh (VMEM-resident)
            pl.BlockSpec((1, HO), lambda t: (0, 0)),         # bias (VMEM-resident)
        ],
        out_specs=(
            pl.BlockSpec((1, B, O), lambda t: (t, 0, 0)),    # per-step log-probs
            pl.BlockSpec((B, H), lambda t: (0, 0)),          # hidden carry / final
        ),
        out_shape=(jax.ShapeDtypeStruct((T, B, O), jnp.float32),
                   jax.ShapeDtypeStruct((B, H), jnp.float32)),
        compiler_params=pltpu.CompilerParams(
            dimension_semantics=("arbitrary",)),   # time recurrence is sequential
        cost_estimate=cost,
    )(xs, h0, packed["wx"], packed["wh"], packed["b"])
    return out, hid


def rnn_forward(x, h, packed):
    """Single-step forward matching RNN.forward(input, hidden)."""
    out, hid = rnn_sequence_forward(x[None], h, packed)
    return out[0], hid


def init_params(key, input_size, hidden_size, output_size):
    """Deterministic nn.Linear-style init (uniform(-1/sqrt(fan_in), 1/sqrt(fan_in)))."""
    k1, k2, k3, k4 = jax.random.split(key, 4)
    fan_in = input_size + hidden_size
    bound = 1.0 / jnp.sqrt(fan_in)
    return {
        "w_i2h": jax.random.uniform(k1, (hidden_size, fan_in), jnp.float32, -bound, bound),
        "b_i2h": jax.random.uniform(k2, (hidden_size,), jnp.float32, -bound, bound),
        "w_i2o": jax.random.uniform(k3, (output_size, fan_in), jnp.float32, -bound, bound),
        "b_i2o": jax.random.uniform(k4, (output_size,), jnp.float32, -bound, bound),
    }


def rnn_sequence_ref(xs, h, params):
    """Pure-JAX reference: apply the PyTorch cell T times."""
    outs = []
    for t in range(xs.shape[0]):
        combined = jnp.concatenate([xs[t], h], axis=1)
        h = combined @ params["w_i2h"].T + params["b_i2h"]
        logits = combined @ params["w_i2o"].T + params["b_i2o"]
        outs.append(jax.nn.log_softmax(logits, axis=1))
    return jnp.stack(outs), h


if __name__ == "__main__":
    key = jax.random.PRNGKey(0)
    T, B = 8, 8                                   # seq length; full f32 sublane group
    input_size, hidden_size, output_size = 16, 32, 8

    kp, kx = jax.random.split(key)
    params = init_params(kp, input_size, hidden_size, output_size)
    packed = prepare_params(params, input_size)   # one-time weight packing

    xs = jax.random.normal(kx, (T, B, input_size), jnp.float32)
    h0 = jnp.zeros((B, hidden_size), jnp.float32)  # RNN.init_hidden() per sequence

    out, hid = rnn_sequence_forward(xs, h0, packed)
    out, hid = jax.block_until_ready(out), jax.block_until_ready(hid)

    out_ref, hid_ref = rnn_sequence_ref(xs, h0, params)
    assert jnp.allclose(out, out_ref, atol=1e-4, rtol=1e-4), "sequence output mismatch"
    assert jnp.allclose(hid, hid_ref, atol=1e-4, rtol=1e-4), "sequence hidden mismatch"

    # Single-step parity with the PyTorch module's forward(input, hidden).
    out1, hid1 = rnn_forward(xs[0], h0, packed)
    out1_ref, hid1_ref = rnn_sequence_ref(xs[:1], h0, params)
    assert jnp.allclose(out1, out1_ref[0], atol=1e-4, rtol=1e-4), "step output mismatch"
    assert jnp.allclose(hid1, hid1_ref, atol=1e-4, rtol=1e-4), "step hidden mismatch"

    print("KERNEL_OK")
</pallas_src>

<mosaic_0001>
module attributes {stable_mosaic.version = 11 : i64} {
  func.func @rnn_seq_kernel(%arg0: i32, %arg1: memref<1x8x16xf32, #tpu.memory_space<vmem>>, %arg2: memref<8x32xf32, #tpu.memory_space<vmem>>, %arg3: memref<16x40xf32, #tpu.memory_space<vmem>>, %arg4: memref<32x40xf32, #tpu.memory_space<vmem>>, %arg5: memref<1x40xf32, #tpu.memory_space<vmem>>, %arg6: memref<1x8x8xf32, #tpu.memory_space<vmem>>, %arg7: memref<8x32xf32, #tpu.memory_space<vmem>>) attributes {dimension_semantics = [#tpu.dimension_semantics<arbitrary>], iteration_bounds = array<i64: 8>, scalar_prefetch = 0 : i64, scratch_operands = 0 : i64, tpu.core_type = #tpu.core_type<tc>, window_params = [{transform_indices = @transform_0, window_bounds = array<i64: 1, 8, 16>}, {pipeline_mode = #tpu.pipeline_mode<synchronous>, transform_indices = @transform_1, window_bounds = array<i64: 8, 32>}, {pipeline_mode = #tpu.pipeline_mode<synchronous>, transform_indices = @transform_2, window_bounds = array<i64: 16, 40>}, {pipeline_mode = #tpu.pipeline_mode<synchronous>, transform_indices = @transform_3, window_bounds = array<i64: 32, 40>}, {pipeline_mode = #tpu.pipeline_mode<synchronous>, transform_indices = @transform_4, window_bounds = array<i64: 1, 40>}, {transform_indices = @transform_5, window_bounds = array<i64: 1, 8, 8>}, {pipeline_mode = #tpu.pipeline_mode<synchronous>, transform_indices = @transform_6, window_bounds = array<i64: 8, 32>}]} {
    %c0_i32 = arith.constant 0 : i32
    %0 = arith.cmpi eq, %arg0, %c0_i32 : i32
    %1 = arith.extui %0 : i1 to i32
    %c0_i32_0 = arith.constant 0 : i32
    %2 = arith.cmpi ne, %1, %c0_i32_0 : i32
    scf.if %2 {
      %c0_19 = arith.constant 0 : index
      %c0_20 = arith.constant 0 : index
      %30 = vector.load %arg2[%c0_19, %c0_20] : memref<8x32xf32, #tpu.memory_space<vmem>>, vector<8x32xf32>
      %c0_21 = arith.constant 0 : index
      %c0_22 = arith.constant 0 : index
      %31 = vector.load %arg7[%c0_21, %c0_22] : memref<8x32xf32, #tpu.memory_space<vmem>>, vector<8x32xf32>
      tpu.vector_store %arg7[%c0_21, %c0_22], %30 {strides = array<i32>} : memref<8x32xf32, #tpu.memory_space<vmem>>, vector<8x32xf32>,
    } else {
    }
    %c0 = arith.constant 0 : index
    %c0_1 = arith.constant 0 : index
    %c0_2 = arith.constant 0 : index
    %3 = vector.load %arg1[%c0, %c0_1, %c0_2] : memref<1x8x16xf32, #tpu.memory_space<vmem>>, vector<1x8x16xf32>
    %4 = vector.shape_cast %3 : vector<1x8x16xf32> to vector<8x16xf32>
    %c0_3 = arith.constant 0 : index
    %c0_4 = arith.constant 0 : index
    %5 = vector.load %arg7[%c0_3, %c0_4] : memref<8x32xf32, #tpu.memory_space<vmem>>, vector<8x32xf32>
    %c0_5 = arith.constant 0 : index
    %c0_6 = arith.constant 0 : index
    %6 = vector.load %arg3[%c0_5, %c0_6] : memref<16x40xf32, #tpu.memory_space<vmem>>, vector<16x40xf32>
    %cst = arith.constant dense<0.000000e+00> : vector<8x40xf32>
    %7 = tpu.matmul %4, %6, %cst {dimension_numbers = #tpu.dot_dimension_numbers<[1], [0], [0], [1], [0, 0, 1, 1], [], []>} : vector<8x16xf32>, vector<16x40xf32>, vector<8x40xf32> -> vector<8x40xf32>
    %c0_7 = arith.constant 0 : index
    %c0_8 = arith.constant 0 : index
    %8 = vector.load %arg4[%c0_7, %c0_8] : memref<32x40xf32, #tpu.memory_space<vmem>>, vector<32x40xf32>
    %cst_9 = arith.constant dense<0.000000e+00> : vector<8x40xf32>
    %9 = tpu.matmul %5, %8, %cst_9 {dimension_numbers = #tpu.dot_dimension_numbers<[1], [0], [0], [1], [0, 0, 1, 1], [], []>} : vector<8x32xf32>, vector<32x40xf32>, vector<8x40xf32> -> vector<8x40xf32>
    %10 = arith.addf %7, %9 : vector<8x40xf32>
    %c0_10 = arith.constant 0 : index
    %c0_11 = arith.constant 0 : index
    %11 = vector.load %arg5[%c0_10, %c0_11] : memref<1x40xf32, #tpu.memory_space<vmem>>, vector<1x40xf32>
    %12 = vector.broadcast %11 : vector<1x40xf32> to vector<8x40xf32>
    %13 = arith.addf %10, %12 : vector<8x40xf32>
    %14 = vector.extract_strided_slice %13 {offsets = [0, 0], sizes = [8, 32], strides = [1, 1]} : vector<8x40xf32> to vector<8x32xf32>
    %c0_12 = arith.constant 0 : index
    %c0_13 = arith.constant 0 : index
    %15 = vector.load %arg7[%c0_12, %c0_13] : memref<8x32xf32, #tpu.memory_space<vmem>>, vector<8x32xf32>
    tpu.vector_store %arg7[%c0_12, %c0_13], %14 {strides = array<i32>} : memref<8x32xf32, #tpu.memory_space<vmem>>, vector<8x32xf32>,
    %16 = vector.extract_strided_slice %13 {offsets = [0, 32], sizes = [8, 8], strides = [1, 1]} : vector<8x40xf32> to vector<8x8xf32>
    %cst_14 = arith.constant dense<0xFF800000> : vector<8xf32>
    %17 = vector.multi_reduction <maximumf>, %16, %cst_14 [1] : vector<8x8xf32> to vector<8xf32>
    %18 = vector.shape_cast %17 : vector<8xf32> to vector<8x1xf32>
    %19 = vector.broadcast %18 : vector<8x1xf32> to vector<8x8xf32>
    %20 = arith.subf %16, %19 : vector<8x8xf32>
    %21 = math.exp %20 : vector<8x8xf32>
    %cst_15 = arith.constant dense<0.000000e+00> : vector<8xf32>
    %22 = vector.multi_reduction <add>, %21, %cst_15 [1] : vector<8x8xf32> to vector<8xf32>
    %23 = vector.shape_cast %22 : vector<8xf32> to vector<8x1xf32>
    %24 = math.log %23 : vector<8x1xf32>
    %25 = vector.broadcast %24 : vector<8x1xf32> to vector<8x8xf32>
    %26 = arith.subf %20, %25 : vector<8x8xf32>
    %c0_16 = arith.constant 0 : index
    %c0_17 = arith.constant 0 : index
    %c0_18 = arith.constant 0 : index
    %27 = vector.load %arg6[%c0_16, %c0_17, %c0_18] : memref<1x8x8xf32, #tpu.memory_space<vmem>>, vector<1x8x8xf32>
    %28 = vector.shape_cast %27 : vector<1x8x8xf32> to vector<8x8xf32>
    %29 = vector.shape_cast %26 : vector<8x8xf32> to vector<1x8x8xf32>
    tpu.vector_store %arg6[%c0_16, %c0_17, %c0_18], %29 {strides = array<i32>} : memref<1x8x8xf32, #tpu.memory_space<vmem>>, vector<1x8x8xf32>,
    return
  }
  func.func @transform_0(%arg0: i32) -> (i32, i32, i32) {
    %c0_i32 = arith.constant 0 : i32
    %c0_i32_0 = arith.constant 0 : i32
    %c0_i32_1 = arith.constant 0 : i32
    return %arg0, %c0_i32, %c0_i32_0 : i32, i32, i32
  }
  func.func @transform_1(%arg0: i32) -> (i32, i32) {
    %c0_i32 = arith.constant 0 : i32
    %c0_i32_0 = arith.constant 0 : i32
    %c0_i32_1 = arith.constant 0 : i32
    return %c0_i32, %c0_i32_0 : i32, i32
  }
  func.func @transform_2(%arg0: i32) -> (i32, i32) {
    %c0_i32 = arith.constant 0 : i32
    %c0_i32_0 = arith.constant 0 : i32
    %c0_i32_1 = arith.constant 0 : i32
    return %c0_i32, %c0_i32_0 : i32, i32
  }
  func.func @transform_3(%arg0: i32) -> (i32, i32) {
    %c0_i32 = arith.constant 0 : i32
    %c0_i32_0 = arith.constant 0 : i32
    %c0_i32_1 = arith.constant 0 : i32
    return %c0_i32, %c0_i32_0 : i32, i32
  }
  func.func @transform_4(%arg0: i32) -> (i32, i32) {
    %c0_i32 = arith.constant 0 : i32
    %c0_i32_0 = arith.constant 0 : i32
    %c0_i32_1 = arith.constant 0 : i32
    return %c0_i32, %c0_i32_0 : i32, i32
  }
  func.func @transform_5(%arg0: i32) -> (i32, i32, i32) {
    %c0_i32 = arith.constant 0 : i32
    %c0_i32_0 = arith.constant 0 : i32
    %c0_i32_1 = arith.constant 0 : i32
    return %arg0, %c0_i32, %c0_i32_0 : i32, i32, i32
  }
  func.func @transform_6(%arg0: i32) -> (i32, i32) {
    %c0_i32 = arith.constant 0 : i32
    %c0_i32_0 = arith.constant 0 : i32
    %c0_i32_1 = arith.constant 0 : i32
    return %c0_i32, %c0_i32_0 : i32, i32
  }
}

</mosaic_0001>

<bundles_post_ra>
// kernel: tpu_custom_call.1
= control target key start
LH: loop header
LB: loop body
LE: loop exit
PB: predicated region body
PF: predicated region fallthrough
CT: control target
= control target key end

     0   :  { %12 = vsyncpa [#allocation3], 0  ;;  %s1342_s0 = inlined_call_operand.hbm [shape: f32[8,8,16], index: 0, kind: input, shape index: {}]   ;;  %s1343_s1 = inlined_call_operand.hbm [shape: f32[8,32], index: 1, kind: input, shape index: {}]   ;;  %s1344_s2 = inlined_call_operand.hbm [shape: f32[16,40], index: 2, kind: input, shape index: {}]   ;;  %s1345_s3 = inlined_call_operand.hbm [shape: f32[32,40], index: 3, kind: input, shape index: {}]   ;;  %s1346_s4 = inlined_call_operand.vmem [shape: f32[1,40], index: 4, kind: input, shape index: {}]   ;;  %s1347_s5 = inlined_call_operand.hbm [shape: f32[8,8,8], index: 5, kind: output, shape index: {0}]   ;;  %s1348_s6 = inlined_call_operand.hbm [shape: f32[8,32], index: 6, kind: output, shape index: {1}]  }
   0x1   :  { %14 = vsyncpa [#allocation3 + $0x1], 0 }
   0x2   :  { %15 = vsyncpa [#allocation6], 0 }
   0x3   :  { %16 = vsyncpa [#allocation9], 0 }
   0x4   :  { %17 = vsyncpa [#allocation4], 0 }
   0x5   :  { %19 = vsyncpa [#allocation4 + $0x1], 0 }
   0x6   :  { %20 = vsyncpa [#allocation12], 0  ;;  %s1058_s21 = smov 0   ;;  %s1060_s22 = smov 0  }
   0x7   :  { %s1062_s23 = smov 0   ;;  %s1064_s24 = smov 0  }
   0x8 LB: > { %s1079_s25 = sadd.s32 4294967295, %s1009_s24   ;;  %s638_s26 = sadd.s32 4294967294, %s1009_s24   ;;  %s1009_s24 = sphi %s1064_s24, %s1376_s24   ;;  %s1005_s23 = sphi %s1062_s23, %s1375_s23   ;;  %s1001_s22 = sphi %s1060_s22, %s1374_s22   ;;  %s997_s21 = sphi %s1058_s21, %s1373_s21  }
   0x9   : > { %p46_p0 = scmp.ne.s32.totalorder %s1001_s22, %s997_s21  ;;  %p1349_p1 = scmp.eq.s32.totalorder %s1079_s25, 0 }
   0xa   : > { %p160_p3 = scmp.eq.s32.totalorder %s638_s26, 7  ;;  %p639_p5 = scmp.ge.s32.totalorder %s1009_s24, 1 }
   0xb   : > { %p1088_p4 = por %p1349_p1, %p46_p0  ;;  %p188_p7 = scmp.lt.s32.totalorder %s1009_s24, 9 }
   0xc   : > { %p1093_p6 = por %p160_p3, %p46_p0  ;;  %s1011_s30 = smov [#allocation5]  }
   0xd   : > { %s1352_s27 = scalar_select %p1088_p4, 1, 0 }
   0xe   : > { %s1353_s28 = scalar_select %p1093_p6, 1, 0 }
   0xf   : > { %p1099_p9 = pnand %p639_p5, %p188_p7  ;;  %s201_s7 = sshll.u32 %s1011_s30, 4  ;;  %s202_s7 = int_to_ptr.vmem [resolvable:$true] %s201_s7 }
  0x10   : > { %s1012_s8 = smov [#allocation7]   ;;  %s1013_s11 = smov [#allocation8]  }
  0x11   : > { %s1354_s29 = scalar_select %p1099_p9, 1, 0 }
  0x12   : > { %p717_p10 = pneg %p1099_p9  ;;  %s211_s9 = sshll.u32 %s1012_s8, 4  ;;  %s1111_s9 = int_to_ptr.vmem [resolvable:$true] %s211_s9 }
  0x13   : > { %s1113_s12 = sshll.u32 %s1013_s11, 4  ;;  %s791_s15 = scalar_lea.hbm %s1343_s1, 128  ;;  %s225_s12 = int_to_ptr.vmem [resolvable:$true] %s1113_s12 }
  0x14   : > { %p1107_p11 = pnand %p717_p10, %p1349_p1  ;;  %p792_p12 = scmp.ne.s32.totalorder %s1343_s1, %s791_s15 }
  0x15   : > { %p798_p5 = scmp.lt.u32.totalorder %s791_s15, %s1343_s1 }
  0x16   : > { %p1123_p13 = pneg %p1107_p11 }
  0x18   : > { %p794_p0 = pnand %p1123_p13, %p792_p12 }
  0x1a   : > { %p795_p3 = pneg %p794_p0 }
  0x1c   : > { %p800_p7 = pnand %p798_p5, %p795_p3 }
  0x1e   : > { %803 = shalt.err (!%p800_p7)
}
  0x1f   : > { %s804_s26 = scalar_lea.vmem %s202_s7, 128  ;;  %p812_p2 = scmp.lt.s32.totalorder %s202_s7, %s202_s7 }
  0x20   : > { %p805_p10 = scmp.ne.s32.totalorder %s202_s7, %s804_s26  ;;  %p813_p6 = scmp.lt.s32.totalorder %s804_s26, %s804_s26 }
  0x22   : > { %p807_p8 = pnand %p805_p10, %p1123_p13  ;;  %p814_p4 = por %p813_p6, %p812_p2 }
  0x24   : > { %p808_p1 = pneg %p807_p8 }
  0x26   : > { %p815_p9 = pnand %p814_p4, %p808_p1 }
  0x28   : > { %818 = shalt.err (!%p815_p9)
}
  0x29   : > { %720 = dma.hbm_to_vmem [thread:$0]  (!%p1107_p11), %s1343_s1, 128, %s202_s7, [#allocation6]  }
  0x2a   : > { %s819_s14 = scalar_lea.hbm %s1344_s2, 256 }
  0x2b   : > { %p820_p8 = scmp.ne.s32.totalorder %s1344_s2, %s819_s14  ;;  %p826_p1 = scmp.lt.u32.totalorder %s819_s14, %s1344_s2 }
  0x2d   : > { %p822_p12 = pnand %p820_p8, %p1123_p13 }
  0x2f   : > { %p823_p2 = pneg %p822_p12 }
  0x31   : > { %p828_p4 = pnand %p826_p1, %p823_p2 }
  0x33   : > { %831 = shalt.err (!%p828_p4)
}
  0x34   : > { %s832_s7 = scalar_lea.vmem %s1111_s9, 256  ;;  %p840_p3 = scmp.lt.s32.totalorder %s1111_s9, %s1111_s9 }
  0x35   : > { %p833_p6 = scmp.ne.s32.totalorder %s1111_s9, %s832_s7  ;;  %p841_p5 = scmp.lt.s32.totalorder %s832_s7, %s832_s7 }
  0x37   : > { %p835_p9 = pnand %p833_p6, %p1123_p13  ;;  %p842_p7 = por %p841_p5, %p840_p3 }
  0x39   : > { %p836_p0 = pneg %p835_p9 }
  0x3b   : > { %p843_p10 = pnand %p842_p7, %p836_p0 }
  0x3d   : > { %846 = shalt.err (!%p843_p10)
}
  0x3e   : > { %s1014_s20 = smov 128   ;;  %s1015_s26 = smov 8  }
  0x3f   : > { %723 = dma.hbm_to_vmem [thread:$0]  (!%p1107_p11), %s1344_s2, 256, %s1111_s9, [#allocation6], %s1014_s20, %s1014_s20, %s1015_s26  }
  0x40   : > { %s847_s14 = scalar_lea.hbm %s1345_s3, 512 }
  0x41   : > { %p848_p8 = scmp.ne.s32.totalorder %s1345_s3, %s847_s14  ;;  %p854_p1 = scmp.lt.u32.totalorder %s847_s14, %s1345_s3 }
  0x43   : > { %p850_p12 = pnand %p848_p8, %p1123_p13 }
  0x45   : > { %p851_p2 = pneg %p850_p12 }
  0x47   : > { %p856_p4 = pnand %p854_p1, %p851_p2 }
  0x49   : > { %859 = shalt.err (!%p856_p4)
}
  0x4a   : > { %s860_s7 = scalar_lea.vmem %s225_s12, 512  ;;  %p868_p3 = scmp.lt.s32.totalorder %s225_s12, %s225_s12 }
  0x4b   : > { %p861_p6 = scmp.ne.s32.totalorder %s225_s12, %s860_s7  ;;  %p869_p5 = scmp.lt.s32.totalorder %s860_s7, %s860_s7 }
  0x4d   : > { %p863_p9 = pnand %p861_p6, %p1123_p13  ;;  %p870_p7 = por %p869_p5, %p868_p3 }
  0x4f   : > { %p864_p0 = pneg %p863_p9 }
  0x51   : > { %p871_p10 = pnand %p870_p7, %p864_p0 }
  0x53   : > { %874 = shalt.err (!%p871_p10)
}
  0x54   : > { %726 = dma.hbm_to_vmem [thread:$0]  (!%p1107_p11), %s1345_s3, 512, %s225_s12, [#allocation9], %s1014_s20, %s1014_s20, %s1015_s26  }
  0x55   : > { %s1182_s18 = sadd.s32 1, %s1009_s24   ;;  %s33_s10 = sadd.s32 1, %s1005_s23 }
  0x56   : > { %s30_s8 = ssub.s32 %s1009_s24, %s1182_s18  ;;  %p40_p8 = scmp.ne.s32.totalorder %s1005_s23, %s1001_s22 }
  0x57   : > { %p31_p13 = scmp.eq.s32.totalorder %s30_s8, 0  ;;  %p41_p12 = scmp.eq.s32.totalorder %s1009_s24, 0 }
  0x58   : > { %p738_p2 = scmp.lt.s32.totalorder %s1009_s24, 8  ;;  %p1357_p4 = scmp.eq.s32.totalorder %s1079_s25, 7 }
  0x59   : > { %s1192_s11 = scalar_select %p31_p13, %s1005_s23, %s33_s10  }
  0x5a   : > { %p42_p1 = por %p41_p12, %p40_p8  ;;  %p1196_p6 = por %p1357_p4, %p40_p8 }
  0x5b   : > { %s241_s14 = sand.u32 1, %s1005_s23   ;;  %s645_s15 = sshll.u32 %s1009_s24, 7 }
  0x5c   : > { %s644_s12 = sshll.u32 %s241_s14, 3  ;;  %s1205_s16 = scalar_lea.hbm %s1342_s0, %s645_s15 }
  0x5d   : > { %s245_s17 = scalar_lea.vmem [#allocation2], %s644_s12  ;;  %p1207_p11 = pnand %p738_p2, %p42_p1 }
  0x5e   : > { %s252_s19 = sshll.u32 %s245_s17, 4  ;;  %s242_s9 = scalar_lea.sflag [#allocation3], %s241_s14  ;;  %s1211_s19 = int_to_ptr.vmem [resolvable:$true] %s252_s19 }
  0x5f   : > { %s875_s30 = scalar_lea.hbm %s1205_s16, 128  ;;  %p877_p0 = pneg %p1207_p11 }
  0x60   : > { %p876_p9 = scmp.ne.s32.totalorder %s1205_s16, %s875_s30  ;;  %s880_s15 = scalar_lea.hbm %s1342_s0, 1024 }
  0x61   : > { %p881_p7 = scmp.lt.u32.totalorder %s1205_s16, %s1342_s0  ;;  %p882_p10 = scmp.lt.u32.totalorder %s880_s15, %s875_s30 }
  0x62   : > { %p878_p3 = pnand %p877_p0, %p876_p9  ;;  %p884_p8 = scmp.lt.u32.totalorder %s875_s30, %s1205_s16 }
  0x63   : > { %p883_p13 = por %p882_p10, %p881_p7 }
  0x64   : > { %p879_p5 = pneg %p878_p3 }
  0x65   : > { %p885_p12 = por %p884_p8, %p883_p13 }
  0x67   : > { %p886_p2 = pnand %p885_p12, %p879_p5 }
  0x69   : > { %889 = shalt.err (!%p886_p2)
}
  0x6a   : > { %s890_s14 = scalar_lea.vmem %s1211_s19, 128  ;;  %s1016_s26 = smov [#allocation2]  }
  0x6b   : > { %p891_p1 = scmp.ne.s32.totalorder %s1211_s19, %s890_s14  ;;  %s895_s17 = sshll.u32 %s1016_s26, 4  ;;  %s896_s17 = int_to_ptr.vmem [resolvable:$false] %s895_s17 }
  0x6c   : > { %s897_s8 = scalar_lea.vmem %s896_s17, 256  ;;  %p898_p3 = scmp.lt.s32.totalorder %s1211_s19, %s896_s17 }
  0x6d   : > { %p893_p4 = pnand %p891_p1, %p877_p0  ;;  %p899_p7 = scmp.lt.s32.totalorder %s897_s8, %s890_s14 }
  0x6f   : > { %p894_p9 = pneg %p893_p4  ;;  %p900_p10 = por %p899_p7, %p898_p3 }
  0x71   : > { %p901_p13 = pnand %p900_p10, %p894_p9 }
  0x73   : > { %904 = shalt.err (!%p901_p13)
}
  0x74   : > { %730 = dma.hbm_to_vmem [thread:$0]  (!%p1207_p11), %s1205_s16, 128, %s1211_s19, %s242_s9  }
  0x75   : > { %p1360_p5 = scmp.ne.s32.totalorder %s1354_s29, 0 }
  0x76   : > { %s1241_s30 = sand.u32 (!%p1360_p5), 1, %s1001_s22   ;;  %p1361_p0 = scmp.ne.s32.totalorder (!%p1360_p5), %s1352_s27, 0 }
  0x77   : > { %261 = sbr.rel (%p1360_p5) target bundleno = 936 (0x3a8), region = 40  ;;  %s647_s10 = sshll.u32 (!%p1360_p5), %s1241_s30, 3 }
  0x78   : > { %s264_s15 = scalar_lea.sflag (!%p1360_p5), [#allocation3], %s1241_s30  ;;  %s1245_s12 = scalar_lea.vmem (!%p1360_p5), [#allocation2], %s647_s10 }
  0x7e   : > { %976 = dma.done.wait (%p1361_p0), %s264_s15, 128  }
  0x7f   : > { %978 = vsyncadd (%p1361_p0), %s264_s15, 4294967168  ;;  %p1362_p11 = scmp.eq.s32.totalorder %s1079_s25, 0 }
  0x81   : > { %980 = dma.done.wait (%p1362_p11), [#allocation6], 384   ;;  %p1363_p8 = pmov %p1362_p11 }
  0x83   : > { %982 = vsyncadd (%p1363_p8), [#allocation6], 4294966912  ;;  %p1364_p12 = pmov %p1363_p8 }
  0x84   : > { %p1365_p2 = pmov %p1363_p8 }
  0x85   : > { %984 = dma.done.wait (%p1364_p12), [#allocation9], 512  }
  0x86   : > { %986 = vsyncadd (%p1365_p2), [#allocation9], 4294966784  ;;  %s1259_s29 = scalar_lea.vmem [#allocation10], %s647_s10  ;;  %p1366_p1 = scmp.ne.s32.totalorder %s1079_s25, 0 }
  0x87   : > { %v312_v0 = vld [vmem:[#allocation5] sm:$0xff] (!%p1366_p1)  ;;  %vm313_vm0 = vcmask (!%p1366_p1), 261120  }
  0x88   : > { %311 = sbr.rel (%p1366_p1) target bundleno = 143 (0x8f), region = 60  ;;  %314 = vst.msk [vmem:[#allocation11] sm:$0xff] (!%p1366_p1), %vm313_vm0, %v312_v0 }
  0x8f PF: > { %v319_v1 = vld [vmem:[#allocation8] sm:$0xff]  ;;  %v320_v2 = vld [vmem:[#allocation8 + $0x8] sm:$0xff]  ;;  %v317_v3 = vld [vmem:[#allocation7] sm:$0xff]  ;;  %v1017_v4 = vmov 0.0|0.0   ;;  %vm1018_vm1 = vmmov 0   ;;  %v1019_v10 = vmov 0.0  }
  0x90   : > { %688 = vmatprep.subr.bf16.mxu0 %v1017_v4  ;;  %v689_v5 = vpack.c.bf16 %v320_v2, %v319_v1  ;;  %694 = vmatprep.subr.bf16.mxu1 %v1017_v4  ;;  %v318_v6 = vld [vmem:[#allocation7 + $0x8] sm:$0xff]  ;;  %v321_v7 = vld [vmem:[#allocation8 + $0x10] sm:$0xff]  ;;  %vm397_vm2 = vcmask 130048   ;;  %vm323_vm3 = vcmask 261120   ;;  %vm480_vm4 = vcmask 326912   ;;  %s1020_s19 = smov 96  }
  0x91   : > { %v322_v8 = vld [vmem:[#allocation8 + $0x18] sm:$0xff]  ;;  %v695_v9 = vpack.c.bf16 %v318_v6, %v317_v3  ;;  %685 = vmatprep.mubr.msk.f32.mxu1 %vm1018_vm1, %v1019_v10  ;;  %678 = vmatprep.mubr.msk.f32.mxu0 %vm1018_vm1, %v1019_v10  ;;  %v316_v13 = vld [vmem:[#allocation11] sm:$0xff]  ;;  %vm491_vm5 = vcmask 64512   ;;  %s1021_s7 = smov [#allocation11]   ;;  %p1367_p9 = scmp.eq.s32.totalorder %s1079_s25, 7 }
  0x92   : > { %690 = vmatpush3.bf16.msra.mxu0 %v689_v5  ;;  %v692_v11 = vpack.c.bf16 %v322_v8, %v321_v7  ;;  %v315_v12 = vld [vmem:[%s1245_s12] sm:$0xff]  ;;  %s528_s9 = sshll.u32 %s1021_s7, 4  ;;  %s529_s9 = int_to_ptr.vmem [resolvable:$true] %s528_s9 }
  0x93   : > { %691 = vmatprep.subr.bf16.mxu0 %v1017_v4  ;;  %696 = vmatpush3.bf16.msra.mxu1 %v695_v9  ;;  %v655_v17 = vld [vmem:[%s1346_s4] ss:$0 sm:$0xff]  ;;  %s905_s20 = scalar_lea.vmem %s529_s9, 128  ;;  %p912_p10 = scmp.lt.s32.totalorder %s529_s9, %s529_s9 }
  0x94   : > { %p906_p4 = scmp.ne.s32.totalorder %s529_s9, %s905_s20  ;;  %p913_p13 = scmp.lt.s32.totalorder %s905_s20, %s905_s20 }
  0x96   : > { %693 = vmatpush3.bf16.msra.mxu0 %v692_v11  ;;  %686 = vmatmul.mubr.msk.f32.vlgmr.msra.gmra.mrb[0].mxu1 %vm397_vm2, %v315_v12  ;;  %p907_p3 = pnand %p906_p4, %p1367_p9  ;;  %p914_p5 = por %p913_p13, %p912_p10 }
  0x98   : > { %p908_p7 = pneg %p907_p3 }
  0x99   : > { %679 = vmatmul.mubr.msk.f32.vlgmr.msra.gmra.mrb[0].mxu0 %vm323_vm3, %v316_v13 }
  0x9a   : > { %p915_p0 = pnand %p914_p5, %p908_p7 }
 0x169   : > { %v467_v14 = vpop.f32.mrb[0].mxu1 }
 0x16a   : > { %v687_v15 = vpop.f32.mrb[1].mxu1 }
 0x16c   : > { %v393_v16 = vpop.f32.mrb[0].mxu0 }
 0x16d   : > { %v468_v18 = vadd.f32 %v467_v14, %v393_v16  ;;  %v680_v19 = vpop.f32.mrb[1].mxu0 }
 0x16f   : > { %v478_v20 = vadd.f32 %v655_v17, %v468_v18 }
 0x171   : > { %479 = vst.msk [vmem:[#allocation11] sm:$0xff] %vm323_vm3, %v478_v20  ;;  %v481_v21 = vsel %vm480_vm4, %v478_v20, -inf }
 0x172   : > { %482 = vmax.xlane.f32.xlu0 %v481_v21 }
 0x1ff   : > { %v483_v22 = vpop.xlane.xlu0 %482 }
 0x200   : > { %v484_v23 = vsub.f32 %v478_v20, %v483_v22 }
 0x202   : > { %v485_v24 = vmul.f32 1.442695, %v484_v23 }
 0x204   : > { %787 = vpow2.f32 %v485_v24 }
 0x20e   : > { %v788_v25 = vpop.eup %787 }
 0x20f   : > { %488 = vrot.lane.b32.xlu0 %v788_v25, %s1020_s19 }
 0x281   : > { %v489_v26 = vpop.permute.xlu0 %488 }
 0x282   : > { %v492_v27 = vsel %vm491_vm5, %v489_v26, 0.0 }
 0x283   : > { %493 = vadd.xlane.f32.xlu1 %v492_v27 }
 0x310   : > { %v494_v28 = vpop.xlane.xlu1 %493 }
 0x311   : > { %789 = vlog2.f32 %v494_v28 }
 0x312   : > { %918 = shalt.err (!%p915_p0)
}
 0x313   : > { %s919_s17 = scalar_lea.hbm %s1348_s6, 128  ;;  %p1368_p8 = pmov %p1367_p9 }
 0x314   : > { %p920_p11 = scmp.ne.s32.totalorder %s1348_s6, %s919_s17  ;;  %p925_p1 = scmp.lt.u32.totalorder %s919_s17, %s1348_s6 }
 0x316   : > { %p921_p12 = pnand %p920_p11, %p1368_p8 }
 0x318   : > { %p922_p2 = pneg %p921_p12 }
 0x31a   : > { %p927_p4 = pnand %p925_p1, %p922_p2 }
 0x31c   : > { %930 = shalt.err (!%p927_p4)
}
 0x31d   : > { %p1369_p9 = pmov %p1368_p8  ;;  %v790_v29 = vpop.eup %789  ;;  %s657_s7 = sshll.u32 %s1079_s25, 7 }
 0x31e   : > { %v496_v30 = vmul.f32 0.6931472, %v790_v29  ;;  %s517_s20 = sshll.u32 %s1259_s29, 4  ;;  %s1293_s17 = scalar_lea.hbm %s1347_s5, %s657_s7  ;;  %s1295_s20 = int_to_ptr.vmem [resolvable:$true] %s517_s20 }
 0x31f   : > { %713 = dma.vmem_to_hbm [thread:$0]  (%p1369_p9), %s529_s9, 128, %s1348_s6, [#allocation12]  }
 0x320   : > { %v497_v31 = vsub.f32 %v484_v23, %v496_v30  ;;  %s504_s9 = scalar_lea.sflag [#allocation4], %s1241_s30  ;;  %s931_s8 = scalar_lea.vmem %s1295_s20, 128 }
 0x321   : > { %p932_p3 = scmp.ne.s32.totalorder %s1295_s20, %s931_s8 }
 0x322   : > { %499 = vrot.lane.b32.xlu1 %v497_v31, %s1020_s19  ;;  %s1022_s19 = smov [#allocation10]  }
 0x323   : > { %p933_p7 = pnand %p932_p3, %p1196_p6  ;;  %s935_s10 = sshll.u32 %s1022_s19, 4  ;;  %s936_s10 = int_to_ptr.vmem [resolvable:$false] %s935_s10 }
 0x324   : > { %s937_s15 = scalar_lea.vmem %s936_s10, 256  ;;  %p938_p13 = scmp.lt.s32.totalorder %s1295_s20, %s936_s10 }
 0x325   : > { %p934_p10 = pneg %p933_p7  ;;  %p939_p5 = scmp.lt.s32.totalorder %s937_s15, %s931_s8 }
 0x327   : > { %p940_p0 = por %p939_p5, %p938_p13 }
 0x329   : > { %p941_p11 = pnand %p940_p0, %p934_p10 }
 0x394   : > { %v500_v32 = vpop.permute.xlu1 %499 }
 0x395   : > { %502 = vst.msk [vmem:[%s1259_s29] sm:$0xff] %vm491_vm5, %v500_v32 }
 0x396   : > { %944 = shalt.err (!%p941_p11)
}
 0x397   : > { %s945_s30 = scalar_lea.hbm %s1293_s17, 128  ;;  %s949_s27 = scalar_lea.hbm %s1347_s5, 1024 }
 0x398   : > { %p946_p8 = scmp.ne.s32.totalorder %s1293_s17, %s945_s30  ;;  %p950_p1 = scmp.lt.u32.totalorder %s1293_s17, %s1347_s5 }
 0x399   : > { %p951_p4 = scmp.lt.u32.totalorder %s949_s27, %s945_s30  ;;  %p953_p3 = scmp.lt.u32.totalorder %s945_s30, %s1293_s17 }
 0x39a   : > { %p947_p12 = pnand %p946_p8, %p1196_p6 }
 0x39b   : > { %p952_p9 = por %p951_p4, %p950_p1 }
 0x39c   : > { %p948_p2 = pneg %p947_p12 }
 0x39d   : > { %p954_p7 = por %p953_p3, %p952_p9 }
 0x39f   : > { %p955_p10 = pnand %p954_p7, %p948_p2 }
 0x3a1   : > { %958 = shalt.err (!%p955_p10)
}
 0x3a2   : > { %711 = dma.vmem_to_hbm [thread:$0]  (%p1196_p6), %s1295_s20, 128, %s1293_s17, %s504_s9  }
 0x3a3   : > { %p1370_p13 = scmp.eq.s32.totalorder %s1079_s25, 7 }
 0x3a5   : > { %988 = dma.done.wait (%p1370_p13), [#allocation12], 128   ;;  %p1371_p5 = pmov %p1370_p13 }
 0x3a7   : > { %990 = vsyncadd (%p1371_p5), [#allocation12], 4294967168 }
 0x3a8 PF: > { %p744_p0 = scmp.ge.s32.totalorder %s1009_s24, 2  ;;  %s544_s14 = sand.u32 1, %s997_s21  }
 0x3a9   : > { %p1372_p11 = scmp.ne.s32.totalorder %s1353_s28, 0  ;;  %s545_s26 = scalar_lea.sflag [#allocation4], %s544_s14 }
 0x3ab   : > { %p732_p8 = pnand %p744_p0, %p1372_p11 }
 0x3ad   : > { %992 = dma.done.wait (!%p732_p8), %s545_s26, 128  }
 0x3ae   : > { %994 = vsyncadd (!%p732_p8), %s545_s26, 4294967168  ;;  %p23_p6 = scmp.ge.s32.totalorder %s1182_s18, 10   ;;  %s1373_s21 = smov %s1001_s22 }
 0x3af   : > { %s1374_s22 = smov %s1005_s23  ;;  %s1375_s23 = smov %s1192_s11 }
 0x3b0   : > { %s1376_s24 = smov %s1182_s18  ;;  %25 = sbr.rel (!%p23_p6) target bundleno = 8 (0x8), region = 109 }
 0x3b7   :  { %550 = vsyncpa [#allocation3], 1 }
 0x3b8   :  { %552 = vsyncpa [#allocation3 + $0x1], 1 }
 0x3b9   :  { %553 = vsyncpa [#allocation6], 1 }
 0x3ba   :  { %554 = vsyncpa [#allocation9], 1 }
 0x3bb   :  { %555 = vsyncpa [#allocation4], 1 }
 0x3bc   :  { %557 = vsyncpa [#allocation4 + $0x1], 1 }
 0x3bd   :  { %558 = vsyncpa [#allocation12], 1 }

</bundles_post_ra>
